<compile_context>
chip_gen: v7x
topology: tpu7x:2x2x1
jax: 0.10.0
libtpu: 0.0.40
codegen_flags: <defaults>
</compile_context>

<pallas_src>
import functools

import jax
import jax.numpy as jnp
from jax.experimental import pallas as pl
from jax.experimental.pallas import tpu as pltpu


def _make_divisible(ch, divisor=8, min_ch=None):
    if min_ch is None:
        min_ch = divisor
    new_ch = max(min_ch, int(ch + divisor / 2) // divisor * divisor)
    if new_ch < 0.9 * ch:
        new_ch += divisor
    return new_ch


def _hardswish(t):
    return t * jnp.clip(t + 3.0, 0.0, 6.0) * (1.0 / 6.0)


def _excite(pooled_f32, w1_ref, b1_ref, w2_ref, b2_ref):
    """fc1 + ReLU, fc2 + hardswish on pooled (n, C) activations; f32 accum."""
    h = jnp.dot(pooled_f32, w1_ref[...], preferred_element_type=jnp.float32)
    h = jnp.maximum(h + b1_ref[...], 0.0)                   # (n, S)
    t = jnp.dot(h, w2_ref[...], preferred_element_type=jnp.float32)
    return _hardswish(t + b2_ref[...])                      # (n, C) f32


# ---------------------------------------------------------------------------
# Fast path A: lane-dense fused kernel.  x block is the flat (n_tile, C*HW)
# slab (full-width, unmasked stores); the channel/spatial split only exists as
# a VMEM-local relayout inside the kernel.
# ---------------------------------------------------------------------------
def _se_fused_flat_kernel(x_ref, w1_ref, b1_ref, w2_ref, b2_ref, o_ref, *,
                          n_tile, c, hw):
    x = x_ref[...].reshape(n_tile, c, hw)                   # VMEM-local relayout
    pooled = jnp.mean(x, axis=-1, dtype=jnp.float32)        # (n_tile, C)
    scale = _excite(pooled, w1_ref, b1_ref, w2_ref, b2_ref)  # (n_tile, C) f32
    out = x * scale[:, :, None]                             # f32 math, bcast HW
    o_ref[...] = out.reshape(n_tile, c * hw).astype(o_ref.dtype)


# ---------------------------------------------------------------------------
# Fast path B (lowering fallback): same fused computation on the (N, C, HW)
# view.  Known-good lowering; pays lane padding for HW not multiple of 128.
# ---------------------------------------------------------------------------
def _se_fused_3d_kernel(x_ref, w1_ref, b1_ref, w2_ref, b2_ref, o_ref):
    x = x_ref[...]                                          # (n_tile, C, HW)
    pooled = jnp.mean(x, axis=-1, dtype=jnp.float32)        # (n_tile, C)
    scale = _excite(pooled, w1_ref, b1_ref, w2_ref, b2_ref)
    o_ref[...] = (x * scale[:, :, None]).astype(o_ref.dtype)


# ---------------------------------------------------------------------------
# Fallback pass 1: HW-tiled pooling + excitation -> per-sample scale (N, C) f32.
# ---------------------------------------------------------------------------
def _se_scale_kernel(x_ref, w1_ref, b1_ref, w2_ref, b2_ref, scale_ref, acc_ref,
                     *, hw_total, hw_tile, mask_last):
    j = pl.program_id(1)
    last = pl.num_programs(1) - 1

    @pl.when(j == 0)
    def _init():
        acc_ref[...] = jnp.zeros_like(acc_ref)

    x = x_ref[...]                                          # (1, C, hw_tile)

    if mask_last:
        # Only the final HW block carries padding -> gate the iota mask so every
        # other step uses the plain (cheaper) sum.
        @pl.when(j == last)
        def _masked_sum():
            col = jax.lax.broadcasted_iota(jnp.int32, x.shape, x.ndim - 1)
            xf = jnp.where(col + j * hw_tile < hw_total,
                           x.astype(jnp.float32), 0.0)
            acc_ref[...] += jnp.sum(xf, axis=-1)

        @pl.when(j != last)
        def _plain_sum():
            acc_ref[...] += jnp.sum(x.astype(jnp.float32), axis=-1)
    else:
        acc_ref[...] += jnp.sum(x.astype(jnp.float32), axis=-1)

    @pl.when(j == last)
    def _finish():
        pooled = acc_ref[...] * (1.0 / hw_total)
        scale_ref[...] = _excite(pooled, w1_ref, b1_ref, w2_ref, b2_ref)


# ---------------------------------------------------------------------------
# Fallback pass 2: tiled broadcast-multiply, fully parallel grid.
# ---------------------------------------------------------------------------
def _se_rescale_kernel(x_ref, scale_ref, o_ref):
    x = x_ref[...]                                          # (1, C, hw_tile)
    o_ref[...] = (x * scale_ref[...][:, :, None]).astype(o_ref.dtype)


# ---------------------------------------------------------------------------
# Per-generation tiling configuration.
# ---------------------------------------------------------------------------
def _chip_config():
    kind = ""
    try:
        kind = jax.devices()[0].device_kind.lower()
    except Exception:
        pass
    vmem_cap = None
    try:
        vmem_cap = int(pltpu.get_tpu_info().vmem_capacity_bytes)
    except Exception:
        pass

    if "7" in kind:
        # v7x: 2 TensorCores, 64 MiB VMEM/TC, 3.2 TB/s HBM -> big blocks,
        # keep >=4 grid steps (2 per core), split tiny batches over HW chunks.
        cfg = dict(min_block_bytes=2 << 20, max_block_bytes=6 << 20,
                   min_grid=4, vmem_limit_bytes=32 << 20, split_small_batch=True)
    elif "v5" in kind and ("lite" in kind or "v5e" in kind):
        # v5e: single TC, 16 MiB scoped-VMEM default (raised explicitly below).
        cfg = dict(min_block_bytes=512 << 10, max_block_bytes=3 << 20,
                   min_grid=2, vmem_limit_bytes=32 << 20, split_small_batch=False)
    else:
        # v6e and other single-TC parts: biggest block that fits, 2 steps is
        # enough for double-buffer overlap ("parallel" does not shard on 1 TC).
        cfg = dict(min_block_bytes=1 << 20, max_block_bytes=6 << 20,
                   min_grid=2, vmem_limit_bytes=32 << 20, split_small_batch=False)

    if vmem_cap:
        cfg["vmem_limit_bytes"] = min(cfg["vmem_limit_bytes"], vmem_cap // 2)
        cfg["max_block_bytes"] = min(cfg["max_block_bytes"],
                                     cfg["vmem_limit_bytes"] // 5)
    return cfg


def _divisor_tiles(n, bytes_per_sample, max_block_bytes, aligned):
    return [t for t in range(1, n + 1)
            if n % t == 0
            and (not aligned or t == n or t % 8 == 0)
            and t * bytes_per_sample <= max_block_bytes]


def _pick_batch_tile(n, bytes_per_sample, min_block_bytes, max_block_bytes,
                     min_grid):
    """Batch tile for the fused flat path.  Prefer tiles that respect the
    (8,128) rule on the second-minor block dim (t % 8 == 0 or t == N), big
    enough to amortize the ~0.35us/step overhead, small enough for VMEM, and
    leaving >= min_grid steps when possible.  None -> use the two-pass path."""
    cands = _divisor_tiles(n, bytes_per_sample, max_block_bytes, aligned=True)
    if not cands:
        cands = _divisor_tiles(n, bytes_per_sample, max_block_bytes, aligned=False)
    if not cands:
        return None
    good = [t for t in cands
            if (n // t) >= min_grid and t * bytes_per_sample >= min_block_bytes]
    if good:
        return min(good)          # smallest tile that already hits min_block
    big = [t for t in cands if t * bytes_per_sample >= min_block_bytes]
    if big:
        return min(big)
    return max(cands)             # everything is small: fewest, biggest blocks


def _pick_hw_tile(hw, c, itemsize, max_block_bytes):
    """Largest lane-aligned (multiple of 128) HW tile within the byte budget;
    full HW if it is small or already fits.  A single 128-lane slab is the
    smallest useful tile, so it is used even if it slightly exceeds the budget
    (<= a few hundred KiB for real nets) rather than silently mis-tiling."""
    if hw <= 128:
        return hw
    max_lanes = max_block_bytes // max(1, c * itemsize)
    if max_lanes >= hw:
        return hw
    tile = (max_lanes // 128) * 128
    return max(tile, 128)


def squeeze_excitation(x_nchw, w1, b1, w2, b2, *, force_two_pass=False,
                       two_pass_block_limit_bytes=None):
    """MobileNetV3 SqueezeExcitation forward.

    x_nchw: (N, C, H, W).  w1: (S, C) fc1 conv weight, b1: (S,).
    w2: (C, S) fc2 conv weight, b2: (C,).
    """
    N, C, H, W = x_nchw.shape
    S = w1.shape[0]
    HW = H * W
    dtype = x_nchw.dtype
    itemsize = jnp.dtype(dtype).itemsize
    cfg = _chip_config()

    # Weights of the two 1x1 convs as plain dense matrices (free reshapes).
    w1_m = w1.T                      # (C, S):  pooled (n, C) @ (C, S)
    w2_m = w2.T                      # (S, C):  h (n, S) @ (S, C)
    b1_m = b1.reshape(1, S)
    b2_m = b2.reshape(1, C)

    w_specs = [
        pl.BlockSpec((C, S), lambda *_: (0, 0)),
        pl.BlockSpec((1, S), lambda *_: (0, 0)),
        pl.BlockSpec((S, C), lambda *_: (0, 0)),
        pl.BlockSpec((1, C), lambda *_: (0, 0)),
    ]
    w_bytes = sum(int(a.size) * jnp.dtype(a.dtype).itemsize
                  for a in (w1_m, b1_m, w2_m, b2_m))

    bytes_per_sample = C * HW * itemsize
    # VMEM budget: double-buffered in + out blocks, double-buffered weights
    # (constant index maps are never re-fetched, but the auto-pipeliner still
    # holds two copies; pl.Buffered(1) on the weight specs would reclaim that,
    # skipped here for lowering portability), plus headroom for compiler scratch.
    budget = cfg["vmem_limit_bytes"] - 2 * w_bytes - (1 << 20)
    max_block = max(min(cfg["max_block_bytes"], budget // 4), 128 * 1024)

    n_tile = None
    if not force_two_pass:
        n_tile = _pick_batch_tile(N, bytes_per_sample, cfg["min_block_bytes"],
                                  max_block, cfg["min_grid"])
        # v7x small-batch: a single fused grid step leaves the second TensorCore
        # idle and serializes read -> compute -> write.  Route to the HW-chunked
        # two-pass path when the sample is big enough for chunking to pay off.
        if (n_tile is not None and cfg["split_small_batch"]
                and (N // n_tile) < 2 and HW >= 256
                and N * bytes_per_sample >= cfg["min_block_bytes"]):
            n_tile = None
            if two_pass_block_limit_bytes is None:
                two_pass_block_limit_bytes = max(C * 128 * itemsize,
                                                 (N * bytes_per_sample) // 4)

    if n_tile is not None:
        grid = (N // n_tile,)
        cost = pl.CostEstimate(
            flops=2 * N * C * HW + 4 * N * C * S,
            transcendentals=0,
            bytes_accessed=2 * N * C * HW * itemsize + w_bytes)
        params = pltpu.CompilerParams(
            dimension_semantics=("parallel",),
            vmem_limit_bytes=cfg["vmem_limit_bytes"])

        # (a) lane-dense flat path: the x/out block last dim is the full,
        #     contiguous C*HW slab -> unmasked full-width stores, no lane
        #     padding for HW = 49/196/784.
        try:
            flat_spec = pl.BlockSpec((n_tile, C * HW), lambda i: (i, 0))
            out = pl.pallas_call(
                functools.partial(_se_fused_flat_kernel,
                                  n_tile=n_tile, c=C, hw=HW),
                out_shape=jax.ShapeDtypeStruct((N, C * HW), dtype),
                grid=grid,
                in_specs=[flat_spec] + w_specs,
                out_specs=flat_spec,
                compiler_params=params,
                cost_estimate=cost,
            )(x_nchw.reshape(N, C * HW), w1_m, b1_m, w2_m, b2_m)
            return out.reshape(N, C, H, W)
        except Exception:
            # Lowering-robustness guard: if this Mosaic build rejects the
            # in-kernel flat <-> (n, C, HW) relayout, use the known-good 3-D
            # fused kernel (same two HBM passes, padded lanes) instead.
            pass

        x_spec = pl.BlockSpec((n_tile, C, HW), lambda i: (i, 0, 0))
        out = pl.pallas_call(
            _se_fused_3d_kernel,
            out_shape=jax.ShapeDtypeStruct((N, C, HW), dtype),
            grid=grid,
            in_specs=[x_spec] + w_specs,
            out_specs=x_spec,
            compiler_params=params,
            cost_estimate=cost,
        )(x_nchw.reshape(N, C, HW), w1_m, b1_m, w2_m, b2_m)
        return out.reshape(N, C, H, W)

    # ---------------- two-pass tiled path (huge samples / v7x tiny batch) ----
    block_limit = (two_pass_block_limit_bytes if two_pass_block_limit_bytes
                   else cfg["max_block_bytes"])
    hw_tile = _pick_hw_tile(HW, C, itemsize, block_limit)
    hw_grid = pl.cdiv(HW, hw_tile)
    mask_last = (HW % hw_tile) != 0

    x_spec = pl.BlockSpec((1, C, hw_tile), lambda i, j: (i, 0, j))
    scale_spec = pl.BlockSpec((1, C), lambda i, j: (i, 0))
    x3 = x_nchw.reshape(N, C, HW)

    scale = pl.pallas_call(
        functools.partial(_se_scale_kernel, hw_total=HW, hw_tile=hw_tile,
                          mask_last=mask_last),
        out_shape=jax.ShapeDtypeStruct((N, C), jnp.float32),
        grid=(N, hw_grid),
        in_specs=[x_spec] + w_specs,
        out_specs=scale_spec,
        scratch_shapes=[pltpu.VMEM((1, C), jnp.float32)],
        compiler_params=pltpu.CompilerParams(
            dimension_semantics=("parallel", "arbitrary"),
            vmem_limit_bytes=cfg["vmem_limit_bytes"]),
        cost_estimate=pl.CostEstimate(
            flops=N * C * HW + 4 * N * C * S,
            transcendentals=0,
            bytes_accessed=N * C * HW * itemsize + w_bytes + N * C * 4),
    )(x3, w1_m, b1_m, w2_m, b2_m)

    out = pl.pallas_call(
        _se_rescale_kernel,
        out_shape=jax.ShapeDtypeStruct((N, C, HW), dtype),
        grid=(N, hw_grid),
        in_specs=[x_spec, scale_spec],
        out_specs=x_spec,
        compiler_params=pltpu.CompilerParams(
            dimension_semantics=("parallel", "parallel"),
            vmem_limit_bytes=cfg["vmem_limit_bytes"]),
        cost_estimate=pl.CostEstimate(
            flops=N * C * HW,
            transcendentals=0,
            bytes_accessed=2 * N * C * HW * itemsize + N * C * 4),
    )(x3, scale)
    return out.reshape(N, C, H, W)


if __name__ == "__main__":
    def reference(x, w1, b1, w2, b2):
        pooled = jnp.mean(x, axis=(2, 3))
        h = jnp.maximum(pooled @ w1.T + b1, 0.0)
        t = h @ w2.T + b2
        scale = t * jnp.clip(t + 3.0, 0.0, 6.0) / 6.0
        return x * scale[:, :, None, None]

    def make_inputs(key, n, c, h, w):
        s = _make_divisible(c // 4, 8)
        kx, k1, k2, k3, k4 = jax.random.split(key, 5)
        x = jax.random.normal(kx, (n, c, h, w), dtype=jnp.float32)
        w1 = jax.random.normal(k1, (s, c), dtype=jnp.float32) * 0.1
        b1 = jax.random.normal(k2, (s,), dtype=jnp.float32) * 0.1
        w2 = jax.random.normal(k3, (c, s), dtype=jnp.float32) * 0.1
        b2 = jax.random.normal(k4, (c,), dtype=jnp.float32) * 0.1
        return x, w1, b1, w2, b2

    key = jax.random.PRNGKey(0)
    k_a, k_b, k_c = jax.random.split(key, 3)

    # --- small shapes consistent with the module (fused lane-dense path) -----
    x, w1, b1, w2, b2 = make_inputs(k_a, 2, 16, 8, 8)
    out = jax.block_until_ready(squeeze_excitation(x, w1, b1, w2, b2))
    assert out.shape == x.shape
    assert jnp.allclose(out, reference(x, w1, b1, w2, b2),
                        atol=1e-5, rtol=1e-5), "fused path mismatch vs reference"

    # --- batch-1 inference shape ---------------------------------------------
    xb, w1b, b1b, w2b, b2b = make_inputs(k_b, 1, 24, 8, 8)
    outb = jax.block_until_ready(squeeze_excitation(xb, w1b, b1b, w2b, b2b))
    assert outb.shape == xb.shape
    assert jnp.allclose(outb, reference(xb, w1b, b1b, w2b, b2b),
                        atol=1e-5, rtol=1e-5), "batch-1 path mismatch vs reference"

    # --- exercise the tiled two-pass fallback (HW tiled, partial last block) --
    xc, w1c, b1c, w2c, b2c = make_inputs(k_c, 2, 32, 18, 18)   # HW=324, tile=256
    outc = jax.block_until_ready(
        squeeze_excitation(xc, w1c, b1c, w2c, b2c,
                           force_two_pass=True,
                           two_pass_block_limit_bytes=32 * 1024))
    assert outc.shape == xc.shape
    assert jnp.allclose(outc, reference(xc, w1c, b1c, w2c, b2c),
                        atol=1e-5, rtol=1e-5), "fallback path mismatch vs reference"

    print("KERNEL_OK")
</pallas_src>

<mosaic_0001>
module attributes {stable_mosaic.version = 11 : i64} {
  func.func @_se_fused_flat_kernel(%arg0: i32, %arg1: memref<2x1024xf32, #tpu.memory_space<vmem>>, %arg2: memref<16x8xf32, #tpu.memory_space<vmem>>, %arg3: memref<1x8xf32, #tpu.memory_space<vmem>>, %arg4: memref<8x16xf32, #tpu.memory_space<vmem>>, %arg5: memref<1x16xf32, #tpu.memory_space<vmem>>, %arg6: memref<2x1024xf32, #tpu.memory_space<vmem>>) attributes {dimension_semantics = [#tpu.dimension_semantics<parallel>], iteration_bounds = array<i64: 1>, scalar_prefetch = 0 : i64, scratch_operands = 0 : i64, tpu.core_type = #tpu.core_type<tc>, window_params = [{transform_indices = @transform_0, window_bounds = array<i64: 2, 1024>}, {pipeline_mode = #tpu.pipeline_mode<synchronous>, transform_indices = @transform_1, window_bounds = array<i64: 16, 8>}, {pipeline_mode = #tpu.pipeline_mode<synchronous>, transform_indices = @transform_2, window_bounds = array<i64: 1, 8>}, {pipeline_mode = #tpu.pipeline_mode<synchronous>, transform_indices = @transform_3, window_bounds = array<i64: 8, 16>}, {pipeline_mode = #tpu.pipeline_mode<synchronous>, transform_indices = @transform_4, window_bounds = array<i64: 1, 16>}, {transform_indices = @transform_5, window_bounds = array<i64: 2, 1024>}]} {
    %c0 = arith.constant 0 : index
    %c0_0 = arith.constant 0 : index
    %0 = vector.load %arg1[%c0, %c0_0] : memref<2x1024xf32, #tpu.memory_space<vmem>>, vector<2x1024xf32>
    %1 = vector.shape_cast %0 : vector<2x1024xf32> to vector<2x16x64xf32>
    %cst = arith.constant dense<0.000000e+00> : vector<2x16xf32>
    %2 = vector.multi_reduction <add>, %1, %cst [2] : vector<2x16x64xf32> to vector<2x16xf32>
    %cst_1 = arith.constant 6.400000e+01 : f32
    %3 = vector.broadcast %cst_1 : f32 to vector<2x16xf32>
    %4 = arith.divf %2, %3 : vector<2x16xf32>
    %c0_2 = arith.constant 0 : index
    %c0_3 = arith.constant 0 : index
    %5 = vector.load %arg2[%c0_2, %c0_3] : memref<16x8xf32, #tpu.memory_space<vmem>>, vector<16x8xf32>
    %cst_4 = arith.constant dense<0.000000e+00> : vector<2x8xf32>
    %6 = tpu.matmul %4, %5, %cst_4 {dimension_numbers = #tpu.dot_dimension_numbers<[1], [0], [0], [1], [0, 0, 1, 1], [], []>} : vector<2x16xf32>, vector<16x8xf32>, vector<2x8xf32> -> vector<2x8xf32>
    %c0_5 = arith.constant 0 : index
    %c0_6 = arith.constant 0 : index
    %7 = vector.load %arg3[%c0_5, %c0_6] : memref<1x8xf32, #tpu.memory_space<vmem>>, vector<1x8xf32>
    %8 = vector.broadcast %7 : vector<1x8xf32> to vector<2x8xf32>
    %9 = arith.addf %6, %8 : vector<2x8xf32>
    %cst_7 = arith.constant 0.000000e+00 : f32
    %10 = vector.broadcast %cst_7 : f32 to vector<2x8xf32>
    %11 = arith.maximumf %9, %10 : vector<2x8xf32>
    %c0_8 = arith.constant 0 : index
    %c0_9 = arith.constant 0 : index
    %12 = vector.load %arg4[%c0_8, %c0_9] : memref<8x16xf32, #tpu.memory_space<vmem>>, vector<8x16xf32>
    %cst_10 = arith.constant dense<0.000000e+00> : vector<2x16xf32>
    %13 = tpu.matmul %11, %12, %cst_10 {dimension_numbers = #tpu.dot_dimension_numbers<[1], [0], [0], [1], [0, 0, 1, 1], [], []>} : vector<2x8xf32>, vector<8x16xf32>, vector<2x16xf32> -> vector<2x16xf32>
    %c0_11 = arith.constant 0 : index
    %c0_12 = arith.constant 0 : index
    %14 = vector.load %arg5[%c0_11, %c0_12] : memref<1x16xf32, #tpu.memory_space<vmem>>, vector<1x16xf32>
    %15 = vector.broadcast %14 : vector<1x16xf32> to vector<2x16xf32>
    %16 = arith.addf %13, %15 : vector<2x16xf32>
    %cst_13 = arith.constant 3.000000e+00 : f32
    %17 = vector.broadcast %cst_13 : f32 to vector<2x16xf32>
    %18 = arith.addf %16, %17 : vector<2x16xf32>
    %cst_14 = arith.constant 0.000000e+00 : f32
    %cst_15 = arith.constant 6.000000e+00 : f32
    %19 = vector.broadcast %cst_14 : f32 to vector<2x16xf32>
    %20 = arith.maximumf %19, %18 : vector<2x16xf32>
    %21 = vector.broadcast %cst_15 : f32 to vector<2x16xf32>
    %22 = arith.minimumf %21, %20 : vector<2x16xf32>
    %23 = arith.mulf %16, %22 : vector<2x16xf32>
    %cst_16 = arith.constant 0.166666672 : f32
    %24 = vector.broadcast %cst_16 : f32 to vector<2x16xf32>
    %25 = arith.mulf %23, %24 : vector<2x16xf32>
    %26 = vector.shape_cast %25 : vector<2x16xf32> to vector<2x16x1xf32>
    %27 = vector.broadcast %26 : vector<2x16x1xf32> to vector<2x16x64xf32>
    %28 = arith.mulf %1, %27 : vector<2x16x64xf32>
    %29 = vector.shape_cast %28 : vector<2x16x64xf32> to vector<2x1024xf32>
    %c0_17 = arith.constant 0 : index
    %c0_18 = arith.constant 0 : index
    %30 = vector.load %arg6[%c0_17, %c0_18] : memref<2x1024xf32, #tpu.memory_space<vmem>>, vector<2x1024xf32>
    tpu.vector_store %arg6[%c0_17, %c0_18], %29 {strides = array<i32>} : memref<2x1024xf32, #tpu.memory_space<vmem>>, vector<2x1024xf32>,
    return
  }
  func.func @transform_0(%arg0: i32) -> (i32, i32) {
    %c0_i32 = arith.constant 0 : i32
    %c0_i32_0 = arith.constant 0 : i32
    return %arg0, %c0_i32 : i32, i32
  }
  func.func @transform_1(%arg0: i32) -> (i32, i32) {
    %c0_i32 = arith.constant 0 : i32
    %c0_i32_0 = arith.constant 0 : i32
    %c0_i32_1 = arith.constant 0 : i32
    return %c0_i32, %c0_i32_0 : i32, i32
  }
  func.func @transform_2(%arg0: i32) -> (i32, i32) {
    %c0_i32 = arith.constant 0 : i32
    %c0_i32_0 = arith.constant 0 : i32
    %c0_i32_1 = arith.constant 0 : i32
    return %c0_i32, %c0_i32_0 : i32, i32
  }
  func.func @transform_3(%arg0: i32) -> (i32, i32) {
    %c0_i32 = arith.constant 0 : i32
    %c0_i32_0 = arith.constant 0 : i32
    %c0_i32_1 = arith.constant 0 : i32
    return %c0_i32, %c0_i32_0 : i32, i32
  }
  func.func @transform_4(%arg0: i32) -> (i32, i32) {
    %c0_i32 = arith.constant 0 : i32
    %c0_i32_0 = arith.constant 0 : i32
    %c0_i32_1 = arith.constant 0 : i32
    return %c0_i32, %c0_i32_0 : i32, i32
  }
  func.func @transform_5(%arg0: i32) -> (i32, i32) {
    %c0_i32 = arith.constant 0 : i32
    %c0_i32_0 = arith.constant 0 : i32
    return %arg0, %c0_i32 : i32, i32
  }
}

module attributes {stable_mosaic.version = 11 : i64} {
  func.func @_se_fused_3d_kernel(%arg0: i32, %arg1: memref<2x16x64xf32, #tpu.memory_space<vmem>>, %arg2: memref<16x8xf32, #tpu.memory_space<vmem>>, %arg3: memref<1x8xf32, #tpu.memory_space<vmem>>, %arg4: memref<8x16xf32, #tpu.memory_space<vmem>>, %arg5: memref<1x16xf32, #tpu.memory_space<vmem>>, %arg6: memref<2x16x64xf32, #tpu.memory_space<vmem>>) attributes {dimension_semantics = [#tpu.dimension_semantics<parallel>], iteration_bounds = array<i64: 1>, scalar_prefetch = 0 : i64, scratch_operands = 0 : i64, tpu.core_type = #tpu.core_type<tc>, window_params = [{transform_indices = @transform_0, window_bounds = array<i64: 2, 16, 64>}, {pipeline_mode = #tpu.pipeline_mode<synchronous>, transform_indices = @transform_1, window_bounds = array<i64: 16, 8>}, {pipeline_mode = #tpu.pipeline_mode<synchronous>, transform_indices = @transform_2, window_bounds = array<i64: 1, 8>}, {pipeline_mode = #tpu.pipeline_mode<synchronous>, transform_indices = @transform_3, window_bounds = array<i64: 8, 16>}, {pipeline_mode = #tpu.pipeline_mode<synchronous>, transform_indices = @transform_4, window_bounds = array<i64: 1, 16>}, {transform_indices = @transform_5, window_bounds = array<i64: 2, 16, 64>}]} {
    %c0 = arith.constant 0 : index
    %c0_0 = arith.constant 0 : index
    %c0_1 = arith.constant 0 : index
    %0 = vector.load %arg1[%c0, %c0_0, %c0_1] : memref<2x16x64xf32, #tpu.memory_space<vmem>>, vector<2x16x64xf32>
    %cst = arith.constant dense<0.000000e+00> : vector<2x16xf32>
    %1 = vector.multi_reduction <add>, %0, %cst [2] : vector<2x16x64xf32> to vector<2x16xf32>
    %cst_2 = arith.constant 6.400000e+01 : f32
    %2 = vector.broadcast %cst_2 : f32 to vector<2x16xf32>
    %3 = arith.divf %1, %2 : vector<2x16xf32>
    %c0_3 = arith.constant 0 : index
    %c0_4 = arith.constant 0 : index
    %4 = vector.load %arg2[%c0_3, %c0_4] : memref<16x8xf32, #tpu.memory_space<vmem>>, vector<16x8xf32>
    %cst_5 = arith.constant dense<0.000000e+00> : vector<2x8xf32>
    %5 = tpu.matmul %3, %4, %cst_5 {dimension_numbers = #tpu.dot_dimension_numbers<[1], [0], [0], [1], [0, 0, 1, 1], [], []>} : vector<2x16xf32>, vector<16x8xf32>, vector<2x8xf32> -> vector<2x8xf32>
    %c0_6 = arith.constant 0 : index
    %c0_7 = arith.constant 0 : index
    %6 = vector.load %arg3[%c0_6, %c0_7] : memref<1x8xf32, #tpu.memory_space<vmem>>, vector<1x8xf32>
    %7 = vector.broadcast %6 : vector<1x8xf32> to vector<2x8xf32>
    %8 = arith.addf %5, %7 : vector<2x8xf32>
    %cst_8 = arith.constant 0.000000e+00 : f32
    %9 = vector.broadcast %cst_8 : f32 to vector<2x8xf32>
    %10 = arith.maximumf %8, %9 : vector<2x8xf32>
    %c0_9 = arith.constant 0 : index
    %c0_10 = arith.constant 0 : index
    %11 = vector.load %arg4[%c0_9, %c0_10] : memref<8x16xf32, #tpu.memory_space<vmem>>, vector<8x16xf32>
    %cst_11 = arith.constant dense<0.000000e+00> : vector<2x16xf32>
    %12 = tpu.matmul %10, %11, %cst_11 {dimension_numbers = #tpu.dot_dimension_numbers<[1], [0], [0], [1], [0, 0, 1, 1], [], []>} : vector<2x8xf32>, vector<8x16xf32>, vector<2x16xf32> -> vector<2x16xf32>
    %c0_12 = arith.constant 0 : index
    %c0_13 = arith.constant 0 : index
    %13 = vector.load %arg5[%c0_12, %c0_13] : memref<1x16xf32, #tpu.memory_space<vmem>>, vector<1x16xf32>
    %14 = vector.broadcast %13 : vector<1x16xf32> to vector<2x16xf32>
    %15 = arith.addf %12, %14 : vector<2x16xf32>
    %cst_14 = arith.constant 3.000000e+00 : f32
    %16 = vector.broadcast %cst_14 : f32 to vector<2x16xf32>
    %17 = arith.addf %15, %16 : vector<2x16xf32>
    %cst_15 = arith.constant 0.000000e+00 : f32
    %cst_16 = arith.constant 6.000000e+00 : f32
    %18 = vector.broadcast %cst_15 : f32 to vector<2x16xf32>
    %19 = arith.maximumf %18, %17 : vector<2x16xf32>
    %20 = vector.broadcast %cst_16 : f32 to vector<2x16xf32>
    %21 = arith.minimumf %20, %19 : vector<2x16xf32>
    %22 = arith.mulf %15, %21 : vector<2x16xf32>
    %cst_17 = arith.constant 0.166666672 : f32
    %23 = vector.broadcast %cst_17 : f32 to vector<2x16xf32>
    %24 = arith.mulf %22, %23 : vector<2x16xf32>
    %25 = vector.shape_cast %24 : vector<2x16xf32> to vector<2x16x1xf32>
    %26 = vector.broadcast %25 : vector<2x16x1xf32> to vector<2x16x64xf32>
    %27 = arith.mulf %0, %26 : vector<2x16x64xf32>
    %c0_18 = arith.constant 0 : index
    %c0_19 = arith.constant 0 : index
    %c0_20 = arith.constant 0 : index
    %28 = vector.load %arg6[%c0_18, %c0_19, %c0_20] : memref<2x16x64xf32, #tpu.memory_space<vmem>>, vector<2x16x64xf32>
    tpu.vector_store %arg6[%c0_18, %c0_19, %c0_20], %27 {strides = array<i32>} : memref<2x16x64xf32, #tpu.memory_space<vmem>>, vector<2x16x64xf32>,
    return
  }
  func.func @transform_0(%arg0: i32) -> (i32, i32, i32) {
    %c0_i32 = arith.constant 0 : i32
    %c0_i32_0 = arith.constant 0 : i32
    %c0_i32_1 = arith.constant 0 : i32
    return %arg0, %c0_i32, %c0_i32_0 : i32, i32, i32
  }
  func.func @transform_1(%arg0: i32) -> (i32, i32) {
    %c0_i32 = arith.constant 0 : i32
    %c0_i32_0 = arith.constant 0 : i32
    %c0_i32_1 = arith.constant 0 : i32
    return %c0_i32, %c0_i32_0 : i32, i32
  }
  func.func @transform_2(%arg0: i32) -> (i32, i32) {
    %c0_i32 = arith.constant 0 : i32
    %c0_i32_0 = arith.constant 0 : i32
    %c0_i32_1 = arith.constant 0 : i32
    return %c0_i32, %c0_i32_0 : i32, i32
  }
  func.func @transform_3(%arg0: i32) -> (i32, i32) {
    %c0_i32 = arith.constant 0 : i32
    %c0_i32_0 = arith.constant 0 : i32
    %c0_i32_1 = arith.constant 0 : i32
    return %c0_i32, %c0_i32_0 : i32, i32
  }
  func.func @transform_4(%arg0: i32) -> (i32, i32) {
    %c0_i32 = arith.constant 0 : i32
    %c0_i32_0 = arith.constant 0 : i32
    %c0_i32_1 = arith.constant 0 : i32
    return %c0_i32, %c0_i32_0 : i32, i32
  }
  func.func @transform_5(%arg0: i32) -> (i32, i32, i32) {
    %c0_i32 = arith.constant 0 : i32
    %c0_i32_0 = arith.constant 0 : i32
    %c0_i32_1 = arith.constant 0 : i32
    return %arg0, %c0_i32, %c0_i32_0 : i32, i32, i32
  }
}

</mosaic_0001>

<bundles_post_ra>
// kernel: tpu_custom_call.1
= control target key start
LH: loop header
LB: loop body
LE: loop exit
PB: predicated region body
PF: predicated region fallthrough
CT: control target
= control target key end

     0   :  { %s892_s20 = smov 64   ;;  %s1121_s0 = inlined_call_operand.vmem [shape: f32[2,1024], index: 0, kind: input, shape index: {}]   ;;  %s1122_s1 = inlined_call_operand.vmem [shape: f32[16,8], index: 1, kind: input, shape index: {}]   ;;  %s1123_s2 = inlined_call_operand.vmem [shape: f32[1,8], index: 2, kind: input, shape index: {}]   ;;  %s1124_s3 = inlined_call_operand.vmem [shape: f32[8,16], index: 3, kind: input, shape index: {}]   ;;  %s1125_s4 = inlined_call_operand.vmem [shape: f32[1,16], index: 4, kind: input, shape index: {}]   ;;  %s1126_s5 = inlined_call_operand.hbm [shape: f32[2,1024], index: 5, kind: output, shape index: {}]  }
   0x1   :  { %v21_v0 = vld [vmem:[%s1121_s0] sm:$0xff] }
   0x2   :  { %26 = vrot.lane.b32.xlu0 %v21_v0, %s892_s20 }
   0x3   :  { %10 = vsyncpa [#allocation3], 0  ;;  %v22_v1 = vld [vmem:[%s1121_s0 + $0x8] sm:$0xff]  ;;  %v893_v2 = vmov 0.0   ;;  %v894_v3 = vmov 1934713408   ;;  %v59_v5 = vlaneseq }
   0x4   :  { %849 = vmatprep.subr.mxu1 %v893_v2  ;;  %v57_v4 = vunpack.c.l.s4 %v894_v3  ;;  %v895_v8 = vmov 1983009808   ;;  %v24_v10 = vrot.slane %v21_v0, 2  ;;  %v30_v11 = vrot.slane %v21_v0, 4 }
   0x5   :  { %v943_v7 = vshrl.u32 %v59_v5, 7  ;;  %v146_v9 = vunpack.c.l.s4 %v895_v8  ;;  %v34_v12 = vrot.slane %v21_v0, 6  ;;  %v39_v23 = vrot.slane %v22_v1, 2 }
   0x6   :  { %41 = vrot.lane.b32.xlu0 %v22_v1, %s892_s20  ;;  %v58_v6 = vunpack.c.0.s8 %v57_v4  ;;  %v45_v25 = vrot.slane %v22_v1, 4  ;;  %v49_v26 = vrot.slane %v22_v1, 6  ;;  %vm215_vm0 = vcmask 523264   ;;  %v233_v4 = vld [vmem:[%s1122_s1] sm:$0xff] }
   0x7   :  { %v147_v15 = vunpack.c.0.s8 %v146_v9  ;;  %v896_v9 = vmov 0.0|0.0   ;;  %vm897_vm1 = vmmov 0   ;;  %vm257_vm2 = vcmask 130112  }
   0x8   :  { %v946_v13 = vsub.s32 %v58_v6, %v943_v7  ;;  %v234_v6 = vld [vmem:[%s1122_s1 + $0x8] sm:$0xff]  ;;  %854 = vmatprep.subr.bf16.mxu0 %v896_v9  ;;  %846 = vmatprep.mubr.msk.f32.mxu0 %vm897_vm1, %v893_v2  ;;  %vm268_vm3 = vcmask 1041409   ;;  %vm270_vm4 = vcmask 130048   ;;  %vm352_vm5 = vcmask 64512  }
   0x9   :  { %v952_v28 = vsub.s32 %v147_v15, %v943_v7  ;;  %v855_v8 = vpack.c.bf16 %v234_v6, %v233_v4  ;;  %851 = vmatprep.mubr.msk.f32.mxu1 %vm897_vm1, %v893_v2 }
   0xb   :  { %856 = vmatpush3.bf16.msra.mxu0 %v855_v8 }
  0x74   :  { %v27_v14 = vpop.permute.xlu0 %26 }
  0x75   :  { %v28_v16 = vrot.slane %v27_v14, 2  ;;  %v32_v17 = vrot.slane %v27_v14, 4  ;;  %v36_v18 = vrot.slane %v27_v14, 6  ;;  %v55_v19 = vcombine.low %v21_v0, %v27_v14 }
  0x77   :  { %v64_v20 = vcombine.low %v24_v10, %v28_v16  ;;  %v73_v21 = vcombine.low %v30_v11, %v32_v17  ;;  %v82_v22 = vcombine.low %v34_v12, %v36_v18  ;;  %v949_v24 = vrot.slane %v55_v19, %v946_v13 }
  0x78   :  { %v42_v27 = vpop.permute.xlu0 %41  ;;  %v247_v10 = vand.u32 127, %v59_v5 }
  0x79   :  { %v955_v29 = vrot.slane %v64_v20, %v946_v13  ;;  %v958_v30 = vrot.slane %v73_v21, %v946_v13  ;;  %v961_v31 = vrot.slane %v82_v22, %v946_v13  ;;  %v43_v32 = vrot.slane %v42_v27, 2 }
  0x7a   :  { %v47_v33 = vrot.slane %v42_v27, 4  ;;  %v51_v34 = vrot.slane %v42_v27, 6  ;;  %v91_v35 = vcombine.low %v22_v1, %v42_v27  ;;  %v252_v12 = vadd.s32 4294967288, %v247_v10 }
  0x7b   :  { %v100_v36 = vcombine.low %v39_v23, %v43_v32  ;;  %v829_v37 = vcombine.high %v949_v24, %v955_v29  ;;  %v830_v38 = vcombine.high %v958_v30, %v961_v31  ;;  %v143_v39 = vcombine.low %v949_v24, %v955_v29 }
  0x7c   :  { %v970_v40 = vrot.slane %v91_v35, %v946_v13  ;;  %v109_v41 = vcombine.low %v45_v25, %v47_v33  ;;  %v118_v42 = vcombine.low %v49_v26, %v51_v34  ;;  %v144_v43 = vcombine.low %v958_v30, %v961_v31  ;;  %v344_v34 = vld [vmem:[%s1124_s3] sm:$0xff] }
  0x7d   :  { %v975_v44 = vrot.slane %v100_v36, %v946_v13  ;;  %v185_v45 = vrot.slane %v829_v37, %v952_v28  ;;  %v192_v46 = vrot.slane %v830_v38, %v952_v28  ;;  %v151_v47 = vrot.slane %v143_v39, %v952_v28  ;;  %850 = vmatpush3.msra.mxu1 %v344_v34  ;;  %v833_v35 = vld [vmem:[%s1123_s2] ss:$0 sm:$0xff]  ;;  %s902_s2 = smov [#allocation2]  }
  0x7e   :  { %v981_v48 = vrot.slane %v109_v41, %v946_v13  ;;  %v984_v49 = vrot.slane %v118_v42, %v946_v13  ;;  %v158_v50 = vrot.slane %v144_v43, %v952_v28  ;;  %v255_v16 = vsub.s32 %v252_v12, %v943_v7  ;;  %v835_v41 = vld [vmem:[%s1125_s4] ss:$0 sm:$0xff]  ;;  %s821_s3 = sshll.u32 %s902_s2, 4  ;;  %s822_s3 = int_to_ptr.vmem [resolvable:$true] %s821_s3 }
  0x7f   :  { %v193_v51 = vcombine.low %v185_v45, %v192_v46  ;;  %v160_v52 = vcombine.low %v970_v40, %v975_v44  ;;  %v831_v53 = vcombine.high %v970_v40, %v975_v44  ;;  %v250_v18 = vsub.s32 %v247_v10, %v943_v7  ;;  %s868_s4 = scalar_lea.vmem %s822_s3, 256  ;;  %p873_p1 = scmp.lt.s32.totalorder %s822_s3, %s822_s3 }
  0x80   :  { %v159_v54 = vcombine.low %v151_v47, %v158_v50  ;;  %v161_v55 = vcombine.low %v981_v48, %v984_v49  ;;  %v832_v56 = vcombine.high %v981_v48, %v984_v49  ;;  %p869_p0 = scmp.ne.s32.totalorder %s822_s3, %s868_s4  ;;  %p874_p2 = scmp.lt.s32.totalorder %s868_s4, %s868_s4 }
  0x81   :  { %v222_v57 = vsel %vm215_vm0, %v193_v51, 0.0  ;;  %v168_v58 = vrot.slane %v160_v52, %v952_v28  ;;  %v202_v61 = vrot.slane %v831_v53, %v952_v28  ;;  %v433_v52 = vsub.s32 0, %v943_v7 }
  0x82   :  { %223 = vadd.xlane.f32.xlu0 %v222_v57  ;;  %v216_v59 = vsel %vm215_vm0, %v159_v54, 0.0  ;;  %v175_v60 = vrot.slane %v161_v55, %v952_v28  ;;  %v209_v62 = vrot.slane %v832_v56, %v952_v28  ;;  %v444_v55 = vsub.s32 1, %v943_v7  ;;  %p875_p3 = por %p874_p2, %p873_p1 }
  0x83   :  { %217 = vadd.xlane.f32.xlu1 %v216_v59  ;;  %v898_v57 = vmov 269488144   ;;  %v899_v59 = vmov 842150450  }
  0x84   :  { %v176_v63 = vcombine.low %v168_v58, %v175_v60  ;;  %v210_v1 = vcombine.low %v202_v61, %v209_v62  ;;  %v458_v58 = vunpack.c.l.s4 %v898_v57  ;;  %v465_v60 = vunpack.c.l.s4 %v899_v59  ;;  %p876_p4 = pnand %p875_p3, %p869_p0 }
  0x85   :  { %v900_v61 = vmov 1414812756  }
  0x86   :  { %v219_v0 = vsel %vm215_vm0, %v176_v63, 0.0  ;;  %v225_v3 = vsel %vm215_vm0, %v210_v1, 0.0  ;;  %v472_v62 = vunpack.c.l.s4 %v900_v61  ;;  %v901_v63 = vmov 1987475062  }
  0x87   :  { %220 = vadd.xlane.f32.xlu1 %v219_v0  ;;  %v479_v0 = vunpack.c.l.s4 %v901_v63  ;;  %v459_v1 = vunpack.c.0.s8 %v458_v58 }
  0x88   :  { %v473_v4 = vunpack.c.0.s8 %v472_v62 }
  0x89   :  { %v480_v6 = vunpack.c.0.s8 %v479_v0  ;;  %v462_v9 = vsub.s32 %v459_v1, %v943_v7 }
  0x8b   :  { %226 = vadd.xlane.f32.xlu1 %v225_v3  ;;  %v466_v3 = vunpack.c.0.s8 %v465_v60  ;;  %v1029_v12 = vsub.s32 %v480_v6, %v943_v7 }
  0x8d   :  { %v469_v10 = vsub.s32 %v466_v3, %v943_v7 }
 0x10f   :  { %v224_v14 = vpop.xlane.xlu0 %223 }
 0x110   :  { %v218_v11 = vpop.xlane.xlu1 %217  ;;  %v231_v19 = vmul.f32 0.015625, %v224_v14 }
 0x111   :  { %v229_v20 = vmul.f32 0.015625, %v218_v11  ;;  %v476_v11 = vsub.s32 %v473_v4, %v943_v7  ;;  %v72_v7 = vcombine.high %v955_v29, %v893_v2 }
 0x112   :  { %v262_v25 = vrot.slane %v231_v19, %v250_v18 }
 0x113   :  { %v251_v26 = vrot.slane %v229_v20, %v250_v18  ;;  %v63_v18 = vcombine.high %v949_v24, %v893_v2  ;;  %v81_v20 = vcombine.high %v958_v30, %v893_v2 }
 0x114   :  { %v221_v15 = vpop.xlane.xlu1 %220 }
 0x115   :  { %v230_v17 = vmul.f32 0.015625, %v221_v15 }
 0x117   :  { %v256_v22 = vrot.slane %v230_v17, %v255_v16 }
 0x118   :  { %v227_v21 = vpop.xlane.xlu1 %226 }
 0x119   :  { %v232_v23 = vmul.f32 0.015625, %v227_v21  ;;  %v258_v5 = vsel %vm257_vm2, %v256_v22, %v251_v26  ;;  %v90_v21 = vcombine.high %v961_v31, %v893_v2 }
 0x11b   :  { %v266_v27 = vrot.slane %v232_v23, %v255_v16 }
 0x11d   :  { %v267_v32 = vsel %vm257_vm2, %v266_v27, %v262_v25 }
 0x11e   :  { %v269_v33 = vsel %vm268_vm3, %v267_v32, %v258_v5 }
 0x11f   :  { %847 = vmatmul.mubr.msk.f32.vlgmr.msra.gmra.mrb[0].mxu0 %vm270_vm4, %v269_v33 }
 0x1f2   :  { %v339_v36 = vpop.f32.mrb[0].mxu0 }
 0x1f3   :  { %v340_v37 = vadd.f32 %v833_v35, %v339_v36  ;;  %v848_v38 = vpop.f32.mrb[1].mxu0 }
 0x1f5   :  { %v343_v39 = vmax.f32 %v340_v37, 0.0 }
 0x1f7   :  { %852 = vmatmul.mubr.msk.f32.vlgmr.msra.gmra.mrb[0].mxu1 %vm352_vm5, %v343_v39 }
 0x2ca   :  { %v422_v42 = vpop.f32.mrb[0].mxu1 }
 0x2cb   :  { %v423_v43 = vadd.f32 %v835_v41, %v422_v42  ;;  %v853_v45 = vpop.f32.mrb[1].mxu1  ;;  %v99_v41 = vcombine.high %v970_v40, %v893_v2  ;;  %v117_v42 = vcombine.high %v981_v48, %v893_v2 }
 0x2cd   :  { %v426_v46 = vadd.f32 3.0, %v423_v43 }
 0x2cf   :  { %v427_v47 = vmax.f32 %v426_v46, 0.0 }
 0x2d1   :  { %v428_v50 = vmin.f32 %v427_v47, 6.0 }
 0x2d3   :  { %v429_v51 = vmul.f32 %v428_v50, %v423_v43 }
 0x2d5   :  { %v430_v53 = vmul.f32 0.16666667, %v429_v51 }
 0x2d7   :  { %v434_v54 = vrot.slane %v430_v53, %v433_v52  ;;  %v445_v56 = vrot.slane %v430_v53, %v444_v55  ;;  %v108_v55 = vcombine.high %v975_v44, %v893_v2 }
 0x2d9   :  { %436 = vbcast.lane.b32.xlu1 %v434_v54, 256 }
 0x2dd   :  { %440 = vbcast.lane.b32.xlu1 %v434_v54, 264 }
 0x2e1   :  { %447 = vbcast.lane.b32.xlu1 %v445_v56, 256 }
 0x2e5   :  { %451 = vbcast.lane.b32.xlu1 %v445_v56, 264 }
 0x34b   :  { %v437_v8 = vpop.permute.xlu1 %436 }
 0x34c   :  { %v463_v15 = vrot.slane %v437_v8, %v462_v9  ;;  %v470_v16 = vrot.slane %v437_v8, %v469_v10  ;;  %v477_v17 = vrot.slane %v437_v8, %v476_v11  ;;  %v484_v19 = vrot.slane %v437_v8, %v1029_v12 }
 0x34e   :  { %v585_v5 = vmul.f32 %v463_v15, %v949_v24  ;;  %v586_v32 = vmul.f32 %v470_v16, %v955_v29  ;;  %v587_v33 = vmul.f32 %v477_v17, %v958_v30  ;;  %v588_v38 = vmul.f32 %v484_v19, %v961_v31 }
 0x34f   :  { %v1031_v14 = vpop.permute.xlu1 %440 }
 0x350   :  { %v505_v39 = vrot.slane %v1031_v14, %v476_v11  ;;  %v491_v24 = vrot.slane %v1031_v14, %v462_v9  ;;  %v498_v58 = vrot.slane %v1031_v14, %v469_v10 }
 0x352   :  { %v591_v54 = vmul.f32 %v505_v39, %v981_v48  ;;  %v589_v59 = vmul.f32 %v491_v24, %v970_v40  ;;  %v126_v40 = vcombine.high %v984_v49, %v893_v2 }
 0x353   :  { %v448_v22 = vpop.permute.xlu1 %447 }
 0x354   :  { %v519_v23 = vrot.slane %v448_v22, %v462_v9  ;;  %v526_v25 = vrot.slane %v448_v22, %v469_v10  ;;  %v533_v26 = vrot.slane %v448_v22, %v476_v11  ;;  %v540_v27 = vrot.slane %v448_v22, %v1029_v12 }
 0x356   :  { %v593_v34 = vmul.f32 %v519_v23, %v63_v18  ;;  %v594_v35 = vmul.f32 %v526_v25, %v72_v7  ;;  %v595_v36 = vmul.f32 %v533_v26, %v81_v20  ;;  %v596_v37 = vmul.f32 %v540_v27, %v90_v21 }
 0x357   :  { %v452_v43 = vpop.permute.xlu1 %451 }
 0x358   :  { %v601_v29 = vcombine.low %v585_v5, %v593_v34  ;;  %v610_v45 = vcombine.low %v586_v32, %v594_v35  ;;  %v619_v30 = vcombine.low %v587_v33, %v595_v36  ;;  %v628_v46 = vcombine.low %v588_v38, %v596_v37 }
 0x359   :  { %v547_v47 = vrot.slane %v452_v43, %v462_v9  ;;  %v554_v50 = vrot.slane %v452_v43, %v469_v10  ;;  %v561_v51 = vrot.slane %v452_v43, %v476_v11  ;;  %v568_v62 = vrot.slane %v452_v43, %v1029_v12 }
 0x35a   :  { %v608_v31 = vrot.slane %v601_v29, %v946_v13  ;;  %v617_v52 = vrot.slane %v610_v45, %v946_v13  ;;  %v626_v53 = vrot.slane %v619_v30, %v946_v13  ;;  %v635_v1 = vrot.slane %v628_v46, %v946_v13 }
 0x35b   :  { %v597_v56 = vmul.f32 %v547_v47, %v99_v41  ;;  %v599_v57 = vmul.f32 %v561_v51, %v117_v42  ;;  %v598_v63 = vmul.f32 %v554_v50, %v108_v55  ;;  %v512_v9 = vrot.slane %v1031_v14, %v1029_v12 }
 0x35c   :  { %v609_v60 = vcombine.high %v608_v31, %v893_v2  ;;  %v618_v61 = vcombine.high %v617_v52, %v893_v2  ;;  %v627_v6 = vcombine.high %v626_v53, %v893_v2  ;;  %v590_v10 = vmul.f32 %v498_v58, %v975_v44 }
 0x35d   :  { %v655_v0 = vcombine.low %v591_v54, %v599_v57  ;;  %v637_v48 = vcombine.low %v589_v59, %v597_v56  ;;  %v600_v11 = vmul.f32 %v568_v62, %v126_v40  ;;  %v636_v18 = vcombine.high %v635_v1, %v893_v2 }
 0x35e   :  { %v680_v3 = vrot.slane %v609_v60, %v952_v28  ;;  %v691_v4 = vrot.slane %v618_v61, %v952_v28  ;;  %v646_v16 = vcombine.low %v590_v10, %v598_v63  ;;  %v702_v17 = vrot.slane %v627_v6, %v952_v28 }
 0x35f   :  { %v662_v8 = vrot.slane %v655_v0, %v946_v13  ;;  %v644_v19 = vrot.slane %v637_v48, %v946_v13  ;;  %v592_v12 = vmul.f32 %v512_v9, %v984_v49  ;;  %v713_v14 = vrot.slane %v636_v18, %v952_v28 }
 0x360   :  { %681 = vrot.lane.b32.xlu0 %v680_v3, %s892_s20  ;;  %692 = vrot.lane.b32.xlu1 %v691_v4, %s892_s20  ;;  %v653_v22 = vrot.slane %v646_v16, %v946_v13 }
 0x361   :  { %v663_v15 = vcombine.high %v662_v8, %v893_v2  ;;  %v664_v44 = vcombine.low %v592_v12, %v600_v11  ;;  %v645_v21 = vcombine.high %v644_v19, %v893_v2 }
 0x362   :  { %v654_v23 = vcombine.high %v653_v22, %v893_v2 }
 0x363   :  { %v746_v20 = vrot.slane %v663_v15, %v952_v28  ;;  %v724_v7 = vrot.slane %v645_v21, %v952_v28  ;;  %v671_v25 = vrot.slane %v664_v44, %v946_v13 }
 0x364   :  { %703 = vrot.lane.b32.xlu1 %v702_v17, %s892_s20  ;;  %v735_v49 = vrot.slane %v654_v23, %v952_v28 }
 0x365   :  { %747 = vrot.lane.b32.xlu0 %v746_v20, %s892_s20  ;;  %v672_v26 = vcombine.high %v671_v25, %v893_v2 }
 0x367   :  { %v757_v27 = vrot.slane %v672_v26, %v952_v28 }
 0x368   :  { %714 = vrot.lane.b32.xlu1 %v713_v14, %s892_s20 }
 0x36c   :  { %725 = vrot.lane.b32.xlu1 %v724_v7, %s892_s20 }
 0x370   :  { %736 = vrot.lane.b32.xlu1 %v735_v49, %s892_s20 }
 0x374   :  { %758 = vrot.lane.b32.xlu1 %v757_v27, %s892_s20 }
 0x3d2   :  { %v693_v5 = vpop.permute.xlu1 %692  ;;  %v682_v32 = vpop.permute.xlu0 %681 }
 0x3d3   :  { %v761_v34 = vsel %vm215_vm0, %v608_v31, %v682_v32  ;;  %v762_v35 = vsel %vm215_vm0, %v617_v52, %v693_v5 }
 0x3d4   :  { %v777_v13 = vcombine.low %v761_v34, %v762_v35 }
 0x3d6   :  { %v704_v33 = vpop.permute.xlu1 %703  ;;  %v785_v39 = vrot.slane %v777_v13, %v952_v28 }
 0x3d7   :  { %v763_v37 = vsel %vm215_vm0, %v626_v53, %v704_v33  ;;  %v748_v45 = vpop.permute.xlu0 %747 }
 0x3d8   :  { %v767_v50 = vsel %vm215_vm0, %v662_v8, %v748_v45 }
 0x3da   :  { %v715_v36 = vpop.permute.xlu1 %714 }
 0x3db   :  { %v764_v38 = vsel %vm215_vm0, %v635_v1, %v715_v36 }
 0x3dc   :  { %v778_v2 = vcombine.low %v763_v37, %v764_v38 }
 0x3de   :  { %v792_v41 = vrot.slane %v778_v2, %v952_v28  ;;  %v726_v42 = vpop.permute.xlu1 %725 }
 0x3df   :  { %v765_v30 = vsel %vm215_vm0, %v644_v19, %v726_v42 }
 0x3e0   :  { %v793_v43 = vcombine.low %v785_v39, %v792_v41 }
 0x3e2   :  { %v737_v24 = vpop.permute.xlu1 %736  ;;  %813 = vst [vmem:[#allocation2] sm:$0xff] %v793_v43 }
 0x3e3   :  { %v766_v29 = vsel %vm215_vm0, %v653_v22, %v737_v24 }
 0x3e4   :  { %v794_v46 = vcombine.low %v765_v30, %v766_v29 }
 0x3e6   :  { %v759_v47 = vpop.permute.xlu1 %758  ;;  %v802_v52 = vrot.slane %v794_v46, %v952_v28 }
 0x3e7   :  { %v768_v51 = vsel %vm215_vm0, %v671_v25, %v759_v47 }
 0x3e8   :  { %v795_v31 = vcombine.low %v767_v50, %v768_v51 }
 0x3ea   :  { %v809_v53 = vrot.slane %v795_v31, %v952_v28 }
 0x3ec   :  { %v810_v54 = vcombine.low %v802_v52, %v809_v53 }
 0x3ee   :  { %814 = vst [vmem:[#allocation2 + $0x8] sm:$0xff] %v810_v54 }
 0x3ef   :  { %879 = shalt.err (!%p876_p4)
}
 0x3f0   :  { %s880_s8 = scalar_lea.hbm %s1126_s5, 256 }
 0x3f1   :  { %p881_p5 = scmp.ne.s32.totalorder %s1126_s5, %s880_s8  ;;  %p884_p6 = scmp.lt.u32.totalorder %s880_s8, %s1126_s5 }
 0x3f3   :  { %p886_p7 = pnand %p884_p6, %p881_p5 }
 0x3f5   :  { %889 = shalt.err (!%p886_p7)
}
 0x3f6   :  { %824 = dma.vmem_to_hbm [thread:$0]  %s822_s3, 256, %s1126_s5, [#allocation3]  }
 0x3f7   :  { %890 = dma.done.wait [#allocation3], 256  }
 0x3f8   :  { %891 = vsyncadd [#allocation3], 4294967040 }
 0x3f9   :  { %828 = vsyncpa [#allocation3], 1 }

// kernel: tpu_custom_call.1
= control target key start
LH: loop header
LB: loop body
LE: loop exit
PB: predicated region body
PF: predicated region fallthrough
CT: control target
= control target key end

     0   :  { %10 = vsyncpa [#allocation3], 0  ;;  %s487_s0 = inlined_call_operand.hbm [shape: f32[2,16,64], index: 0, kind: input, shape index: {}]   ;;  %s488_s1 = inlined_call_operand.vmem [shape: f32[16,8], index: 1, kind: input, shape index: {}]   ;;  %s489_s2 = inlined_call_operand.vmem [shape: f32[1,8], index: 2, kind: input, shape index: {}]   ;;  %s490_s3 = inlined_call_operand.vmem [shape: f32[8,16], index: 3, kind: input, shape index: {}]   ;;  %s491_s4 = inlined_call_operand.vmem [shape: f32[1,16], index: 4, kind: input, shape index: {}]   ;;  %s492_s5 = inlined_call_operand.hbm [shape: f32[2,16,64], index: 5, kind: output, shape index: {}]  }
   0x1   :  { %11 = vsyncpa [#allocation4], 0  ;;  %s381_s18 = smov [#allocation2]   ;;  %s333_s22 = scalar_lea.hbm %s487_s0, 512 }
   0x2   :  { %s17_s19 = sshll.u32 %s381_s18, 4  ;;  %p334_p0 = scmp.ne.s32.totalorder %s487_s0, %s333_s22  ;;  %s18_s19 = int_to_ptr.vmem [resolvable:$true] %s17_s19 }
   0x3   :  { %p337_p1 = scmp.lt.u32.totalorder %s333_s22, %s487_s0 }
   0x5   :  { %p339_p2 = pnand %p337_p1, %p334_p0 }
   0x7   :  { %342 = shalt.err (!%p339_p2)
}
   0x8   :  { %s343_s27 = scalar_lea.vmem %s18_s19, 512  ;;  %p348_p4 = scmp.lt.s32.totalorder %s18_s19, %s18_s19 }
   0x9   :  { %p344_p3 = scmp.ne.s32.totalorder %s18_s19, %s343_s27  ;;  %p349_p5 = scmp.lt.s32.totalorder %s343_s27, %s343_s27 }
   0xb   :  { %p350_p6 = por %p349_p5, %p348_p4 }
   0xd   :  { %p351_p7 = pnand %p350_p6, %p344_p3 }
   0xf   :  { %354 = shalt.err (!%p351_p7)
}
  0x10   :  { %s382_s28 = smov 128   ;;  %s383_s29 = smov 8  }
  0x11   :  { %23 = dma.hbm_to_vmem [thread:$0]  %s487_s0, 512, %s18_s19, [#allocation3], %s382_s28, %s382_s28, %s383_s29  }
  0x12   :  { %377 = dma.done.wait [#allocation3], 512  }
  0x13   :  { %378 = vsyncadd [#allocation3], 4294966784  ;;  %vm39_vm0 = vcmask 523264   ;;  %v433_v0 = vld [vmem:[#allocation2 + $0x10] sm:$0xff]  ;;  %v435_v1 = vld [vmem:[#allocation2] sm:$0xff]  ;;  %v384_v11 = vmov 0.0|0.0   ;;  %v70_v13 = vlaneseq }
  0x14   :  { %v437_v2 = vld [vmem:[#allocation2 + $0x18] sm:$0xff]  ;;  %v46_v3 = vsel %vm39_vm0, %v433_v0, 0.0  ;;  %v40_v4 = vsel %vm39_vm0, %v435_v1, 0.0  ;;  %v443_v5 = vld [vmem:[#allocation2 + $0x8] sm:$0xff]  ;;  %v57_v8 = vld [vmem:[%s488_s1] sm:$0xff]  ;;  %323 = vmatprep.subr.bf16.mxu0 %v384_v11  ;;  %vm385_vm1 = vmmov 0  }
  0x15   :  { %47 = vadd.xlane.f32.xlu1 %v46_v3  ;;  %41 = vadd.xlane.f32.xlu0 %v40_v4  ;;  %v49_v6 = vsel %vm39_vm0, %v437_v2, 0.0  ;;  %v43_v7 = vsel %vm39_vm0, %v443_v5, 0.0  ;;  %v58_v9 = vld [vmem:[%s488_s1 + $0x8] sm:$0xff]  ;;  %v386_v12 = vmov 0.0   ;;  %v71_v14 = vand.u32 127, %v70_v13  ;;  %v168_v34 = vld [vmem:[%s490_s3] sm:$0xff] }
  0x16   :  { %v324_v10 = vpack.c.bf16 %v58_v9, %v57_v8  ;;  %315 = vmatprep.mubr.msk.f32.mxu0 %vm385_vm1, %v386_v12  ;;  %318 = vmatprep.subr.mxu1 %v386_v12  ;;  %v73_v15 = vshrl.u32 %v70_v13, 7  ;;  %vm81_vm2 = vcmask 130112   ;;  %vm92_vm3 = vcmask 1041409   ;;  %v302_v35 = vld [vmem:[%s489_s2] ss:$0 sm:$0xff]  ;;  %s387_s2 = smov [#allocation5]  }
  0x17   :  { %320 = vmatprep.mubr.msk.f32.mxu1 %vm385_vm1, %v386_v12  ;;  %v76_v16 = vadd.s32 4294967288, %v71_v14  ;;  %vm94_vm4 = vcmask 130048   ;;  %319 = vmatpush3.msra.mxu1 %v168_v34  ;;  %vm176_vm5 = vcmask 64512   ;;  %v304_v40 = vld [vmem:[%s491_s4] ss:$0 sm:$0xff]  ;;  %s290_s3 = sshll.u32 %s387_s2, 4  ;;  %s291_s3 = int_to_ptr.vmem [resolvable:$true] %s290_s3 }
  0x18   :  { %325 = vmatpush3.bf16.msra.mxu0 %v324_v10  ;;  %v74_v19 = vsub.s32 %v71_v14, %v73_v15  ;;  %v257_v48 = vsub.s32 0, %v73_v15  ;;  %v268_v51 = vsub.s32 1, %v73_v15  ;;  %s355_s4 = scalar_lea.vmem %s291_s3, 512  ;;  %p360_p9 = scmp.lt.s32.totalorder %s291_s3, %s291_s3 }
  0x19   :  { %50 = vadd.xlane.f32.xlu1 %v49_v6  ;;  %44 = vadd.xlane.f32.xlu0 %v43_v7  ;;  %v79_v22 = vsub.s32 %v76_v16, %v73_v15  ;;  %p356_p8 = scmp.ne.s32.totalorder %s291_s3, %s355_s4  ;;  %p361_p10 = scmp.lt.s32.totalorder %s355_s4, %s355_s4 }
  0x1b   :  { %p362_p11 = por %p361_p10, %p360_p9 }
  0x1d   :  { %p363_p12 = pnand %p362_p11, %p356_p8 }
  0xa2   :  { %v48_v17 = vpop.xlane.xlu1 %47  ;;  %v42_v18 = vpop.xlane.xlu0 %41 }
  0xa3   :  { %v55_v20 = vmul.f32 0.015625, %v48_v17  ;;  %v53_v21 = vmul.f32 0.015625, %v42_v18 }
  0xa5   :  { %v86_v27 = vrot.slane %v55_v20, %v74_v19  ;;  %v75_v28 = vrot.slane %v53_v21, %v74_v19 }
  0xa6   :  { %v51_v23 = vpop.xlane.xlu1 %50  ;;  %v45_v24 = vpop.xlane.xlu0 %44 }
  0xa7   :  { %v56_v25 = vmul.f32 0.015625, %v51_v23  ;;  %v54_v26 = vmul.f32 0.015625, %v45_v24 }
  0xa9   :  { %v90_v29 = vrot.slane %v56_v25, %v79_v22  ;;  %v80_v30 = vrot.slane %v54_v26, %v79_v22 }
  0xab   :  { %v82_v31 = vsel %vm81_vm2, %v80_v30, %v75_v28  ;;  %v91_v32 = vsel %vm81_vm2, %v90_v29, %v86_v27 }
  0xac   :  { %v93_v33 = vsel %vm92_vm3, %v91_v32, %v82_v31 }
  0xad   :  { %316 = vmatmul.mubr.msk.f32.vlgmr.msra.gmra.mrb[0].mxu0 %vm94_vm4, %v93_v33 }
 0x180   :  { %v163_v36 = vpop.f32.mrb[0].mxu0 }
 0x181   :  { %v164_v37 = vadd.f32 %v302_v35, %v163_v36  ;;  %v317_v38 = vpop.f32.mrb[1].mxu0 }
 0x183   :  { %v167_v39 = vmax.f32 %v164_v37, 0.0 }
 0x185   :  { %321 = vmatmul.mubr.msk.f32.vlgmr.msra.gmra.mrb[0].mxu1 %vm176_vm5, %v167_v39 }
 0x258   :  { %v246_v41 = vpop.f32.mrb[0].mxu1 }
 0x259   :  { %v247_v42 = vadd.f32 %v304_v40, %v246_v41  ;;  %v322_v43 = vpop.f32.mrb[1].mxu1 }
 0x25b   :  { %v250_v44 = vadd.f32 3.0, %v247_v42 }
 0x25d   :  { %v251_v45 = vmax.f32 %v250_v44, 0.0 }
 0x25f   :  { %v252_v46 = vmin.f32 %v251_v45, 6.0 }
 0x261   :  { %v253_v47 = vmul.f32 %v252_v46, %v247_v42 }
 0x263   :  { %v254_v49 = vmul.f32 0.16666667, %v253_v47 }
 0x265   :  { %v258_v50 = vrot.slane %v254_v49, %v257_v48  ;;  %v269_v52 = vrot.slane %v254_v49, %v268_v51 }
 0x267   :  { %264 = vbcast.lane.b32.xlu1 %v258_v50, 264  ;;  %260 = vbcast.lane.b32.xlu0 %v258_v50, 256 }
 0x26b   :  { %271 = vbcast.lane.b32.xlu1 %v269_v52, 256 }
 0x26f   :  { %275 = vbcast.lane.b32.xlu1 %v269_v52, 264 }
 0x2d9   :  { %v265_v53 = vpop.permute.xlu1 %264  ;;  %v261_v54 = vpop.permute.xlu0 %260 }
 0x2da   :  { %v278_v55 = vmul.f32 %v265_v53, %v443_v5  ;;  %v277_v56 = vmul.f32 %v261_v54, %v435_v1 }
 0x2dc   :  { %282 = vst.msk [vmem:[#allocation5 + $0x8] sm:$0xff] %vm39_vm0, %v278_v55  ;;  %281 = vst.msk [vmem:[#allocation5] sm:$0xff] %vm39_vm0, %v277_v56 }
 0x2dd   :  { %v272_v57 = vpop.permute.xlu1 %271 }
 0x2de   :  { %v279_v58 = vmul.f32 %v272_v57, %v433_v0 }
 0x2e0   :  { %283 = vst.msk [vmem:[#allocation5 + $0x10] sm:$0xff] %vm39_vm0, %v279_v58 }
 0x2e1   :  { %v276_v59 = vpop.permute.xlu1 %275 }
 0x2e2   :  { %v280_v60 = vmul.f32 %v276_v59, %v437_v2 }
 0x2e4   :  { %284 = vst.msk [vmem:[#allocation5 + $0x18] sm:$0xff] %vm39_vm0, %v280_v60 }
 0x2e5   :  { %366 = shalt.err (!%p363_p12)
}
 0x2e6   :  { %s367_s17 = scalar_lea.hbm %s492_s5, 512 }
 0x2e7   :  { %p368_p13 = scmp.ne.s32.totalorder %s492_s5, %s367_s17  ;;  %p371_p0 = scmp.lt.u32.totalorder %s367_s17, %s492_s5 }
 0x2e9   :  { %p373_p1 = pnand %p371_p0, %p368_p13 }
 0x2eb   :  { %376 = shalt.err (!%p373_p1)
}
 0x2ec   :  { %296 = dma.vmem_to_hbm [thread:$0]  %s291_s3, 512, %s492_s5, [#allocation4], %s382_s28, %s382_s28, %s383_s29  }
 0x2ed   :  { %379 = dma.done.wait [#allocation4], 512  }
 0x2ee   :  { %380 = vsyncadd [#allocation4], 4294966784 }
 0x2ef   :  { %300 = vsyncpa [#allocation3], 1 }
 0x2f0   :  { %301 = vsyncpa [#allocation4], 1 }

</bundles_post_ra>
